<compile_context>
chip_gen: v6e
topology: v6e:2x2x1
jax: 0.10.0
libtpu: 0.0.40
codegen_flags: <defaults>
</compile_context>

<pallas_src>
import functools

import numpy as np
import jax
import jax.numpy as jnp
from jax.experimental import pallas as pl
from jax.experimental.pallas import tpu as pltpu

_EPS = 1e-6  # torch.nn.functional.pairwise_distance default


def _make_magnet_kernel(margin, tile):
    margin = float(margin)

    def kernel(bi_ref, bj_ref, fi_ref, fj_ref, li_ref, lj_ref, r_ref, c_ref,
               out_ref):
        t = pl.program_id(0)
        i_blk = bi_ref[t]
        j_blk = bj_ref[t]

        fi = fi_ref[...]            # (T, D) f32, re-DMA'd only when bi changes
        fj = fj_ref[...]            # (T, D) f32, streamed per step

        # Gram block on the MXU: G[a, b] = <f_i[a], f_j[b]>.
        g = jax.lax.dot_general(fi, fj, (((1,), (1,)), ((), ())),
                                preferred_element_type=jnp.float32)  # (T, T)

        # j-side per-row terms from the resident (n, T) tables (no per-step DMA).
        c_j = c_ref[pl.ds(j_blk, 1), :]       # (1, T) f32
        l_j = lj_ref[pl.ds(j_blk, 1), :]      # (1, T) int32

        # Squared pairwise distance incl. the pairwise_distance eps term
        # (carried inside r/c):  d^2 = r_i + c_j - 2 <f_i, f_j>.
        dist_sq = jnp.maximum(r_ref[...] + c_j - 2.0 * g, 0.0)
        dist = jnp.sqrt(dist_sq)                     # EUP slot
        hinge = jnp.maximum(margin - dist, 0.0)

        same = li_ref[...] == l_j                    # (T, T) bool
        contrib = jnp.where(same, dist_sq, hinge * hinge)

        # Off-diagonal blocks also stand in for their mirrored (j, i) block.
        weight = jnp.where(i_blk == j_blk, 1.0, 2.0)
        out_ref[0] = weight * jnp.sum(contrib, axis=0, keepdims=True)  # (1, T)

    return kernel


def _pick_tile(batch, feat_dim):
    """Generation-aware pair-block tile size."""
    if batch <= 128:
        return max(8, ((batch + 7) // 8) * 8)        # single block
    kind = ""
    try:
        kind = jax.devices()[0].device_kind.lower()
    except Exception:
        pass
    # 128x128-MXU generations (v2-v5, incl. v5e with its 16 MiB scoped-VMEM
    # default) and unknown backends: stay at 128.
    if (not kind) or any(tag in kind for tag in ("v2", "v3", "v4", "v5")):
        return 128
    # v6e / v7x: 256x256 MXU -> 256-wide Gram tiles (half the f_j streaming and
    # half the grid steps); back off for very wide embeddings so the
    # double-buffered feature tiles stay well inside v7x's 64 MiB VMEM.
    return 256 if feat_dim <= 2048 else 128


@functools.partial(jax.jit, static_argnames=("margin",))
def _magnet_loss_pallas(features, labels, margin):
    features = features.astype(jnp.float32)
    labels = labels.astype(jnp.int32)
    B, D = features.shape
    margin = float(margin)

    tile = _pick_tile(B, D)
    b_pad = pl.cdiv(B, tile) * tile
    pad = b_pad - B
    n = b_pad // tile

    # Upper-triangular block list (bi <= bj), bi-major so bi changes rarely and
    # the f_i / r_i / label_i blocks are only re-fetched on bi changes.
    blocks = [(bi, bj) for bi in range(n) for bj in range(bi, n)]
    n_blocks = len(blocks)
    bi_idx = jnp.asarray(np.array([b[0] for b in blocks], np.int32))
    bj_idx = jnp.asarray(np.array([b[1] for b in blocks], np.int32))

    # Per-row terms so the kernel never touches O(B^2 * D) elementwise data:
    #   r_i = ||f_i||^2 + 2*eps*sum(f_i) + D*eps^2/2
    #   c_j = ||f_j||^2 - 2*eps*sum(f_j) + D*eps^2/2
    nrm = jnp.sum(features * features, axis=1)
    ssum = jnp.sum(features, axis=1)
    half_eps = 0.5 * D * _EPS * _EPS
    r_real = nrm + (2.0 * _EPS) * ssum + half_eps
    c_real = nrm - (2.0 * _EPS) * ssum + half_eps

    # Bake padding out of the inner loop:
    #   * padded feature rows are zero,
    #   * padded r/c get +margin^2+1 -> every hinge touching a pad row is 0,
    #   * padded labels are pairwise distinct and < min(labels) -> no padded
    #     pair is "same" except the diagonal (corrected in closed form below).
    bump = margin * margin + 1.0
    f = jnp.pad(features, ((0, pad), (0, 0)))
    r = jnp.pad(r_real, (0, pad), constant_values=half_eps + bump)
    c = jnp.pad(c_real, (0, pad), constant_values=half_eps + bump)
    if pad:
        pad_labels = (jnp.min(labels) - 1) - jnp.arange(pad, dtype=jnp.int32)
        lab = jnp.concatenate([labels, pad_labels])
    else:
        lab = labels

    lab_row = lab.reshape(b_pad, 1)     # column orientation, blocked by bi
    r_row = r.reshape(b_pad, 1)
    lab_tbl = lab.reshape(n, tile)      # row orientation, fully VMEM-resident
    c_tbl = c.reshape(n, tile)

    cost = pl.CostEstimate(
        flops=2 * n_blocks * tile * tile * D + 12 * n_blocks * tile * tile,
        transcendentals=n_blocks * tile * tile,
        bytes_accessed=(n_blocks + n) * tile * D * 4
        + n_blocks * tile * 4 + 4 * b_pad * 4,
    )

    # VMEM budget (double-buffered feature tiles dominate); raise the scoped
    # limit only when needed, capped v7x-safe.
    vmem_est = (4 * tile * D * 4            # fi/fj double buffers
                + 4 * tile * 128 * 4        # (tile,1) r/label blocks, 2 bufs each
                + 4 * max(8, n) * tile * 4  # resident label/c tables
                + 2 * 8 * tile * 4          # output row blocks
                + 10 * tile * tile * 4)     # per-block (T,T) intermediates
    params = {"dimension_semantics": ("parallel",)}
    if vmem_est > 12 * 1024 * 1024:
        params["vmem_limit_bytes"] = min(int(vmem_est * 1.5), 56 * 1024 * 1024)

    out = pl.pallas_call(
        _make_magnet_kernel(margin, tile),
        out_shape=jax.ShapeDtypeStruct((n_blocks, 1, tile), jnp.float32),
        grid_spec=pltpu.PrefetchScalarGridSpec(
            num_scalar_prefetch=2,
            grid=(n_blocks,),
            in_specs=[
                pl.BlockSpec((tile, D), lambda t, bi, bj: (bi[t], 0)),   # f_i
                pl.BlockSpec((tile, D), lambda t, bi, bj: (bj[t], 0)),   # f_j
                pl.BlockSpec((tile, 1), lambda t, bi, bj: (bi[t], 0)),   # labels_i
                pl.BlockSpec((n, tile), lambda t, bi, bj: (0, 0)),       # labels tbl (resident)
                pl.BlockSpec((tile, 1), lambda t, bi, bj: (bi[t], 0)),   # r_i
                pl.BlockSpec((n, tile), lambda t, bi, bj: (0, 0)),       # c tbl (resident)
            ],
            out_specs=pl.BlockSpec((1, 1, tile), lambda t, bi, bj: (t, 0, 0)),
        ),
        compiler_params=pltpu.CompilerParams(**params),
        cost_estimate=cost,
    )(bi_idx, bj_idx, f, f, lab_row, lab_tbl, r_row, c_tbl)

    # Remove the closed-form diagonal contributions the unmasked kernel counted
    # exactly once each:
    #   real i==i pairs:   d^2 = D*eps^2
    #   padded i==i pairs: d^2 = D*eps^2 + 2*bump
    denom = float(max(1, B * B - B))
    diag_corr = B * (D * _EPS * _EPS) + pad * (D * _EPS * _EPS + 2.0 * bump)
    return (jnp.sum(out) - diag_corr) / denom


class MagnetLoss:
    """JAX/Pallas port of the PyTorch MagnetLoss module (forward only)."""

    def __init__(self, margin=2):
        self.margin = float(margin)

    def __call__(self, features, labels):
        features = jnp.asarray(features, jnp.float32)   # [B, D] embeddings
        labels = jnp.asarray(labels, jnp.int32)         # [B] class ids
        return _magnet_loss_pallas(features, labels, self.margin)


def _reference(features, labels, margin=2.0):
    """Pure-JAX reference mirroring the PyTorch loop (vectorized)."""
    f = jnp.asarray(features, jnp.float32)
    lab = jnp.asarray(labels)
    B = f.shape[0]
    diff = f[:, None, :] - f[None, :, :] + _EPS       # pairwise_distance eps
    dist = jnp.sqrt(jnp.sum(diff * diff, axis=-1))
    same = lab[:, None] == lab[None, :]
    offdiag = ~jnp.eye(B, dtype=bool)
    same_loss = jnp.sum(jnp.where(same & offdiag, dist * dist, 0.0))
    hinge = jnp.maximum(margin - dist, 0.0)
    diff_loss = jnp.sum(jnp.where((~same) & offdiag, hinge * hinge, 0.0))
    return (same_loss + diff_loss) / max(1, B * B - B)


if __name__ == "__main__":
    key = jax.random.PRNGKey(0)
    k1, k2, k3, k4, k5, k6 = jax.random.split(key, 6)

    # Small batch, single tile.
    B, D = 32, 32
    features = jax.random.normal(k1, (B, D), jnp.float32)
    labels = jax.random.randint(k2, (B,), 0, 4, jnp.int32)
    loss = MagnetLoss(margin=2)(features, labels)
    jax.block_until_ready(loss)
    ref = _reference(features, labels, margin=2.0)
    assert jnp.allclose(loss, ref, rtol=1e-4, atol=1e-5), (loss, ref)

    # Non-multiple-of-8 batch + different margin; features scaled down so the
    # hinge branch is actually active (exercises padding bump + hinge path).
    B2, D2 = 37, 48
    f2 = 0.15 * jax.random.normal(k3, (B2, D2), jnp.float32)
    l2 = jax.random.randint(k4, (B2,), 0, 5, jnp.int32)
    out2 = MagnetLoss(margin=1.5)(f2, l2)
    jax.block_until_ready(out2)
    r2 = _reference(f2, l2, margin=1.5)
    assert jnp.allclose(out2, r2, rtol=1e-4, atol=1e-5), (out2, r2)

    # Multi-tile batch: exercises the triangular block grid and the 2x
    # off-diagonal weighting on every generation (n >= 2 for 128 and 256 tiles).
    B3, D3 = 300, 64
    f3 = 0.2 * jax.random.normal(k5, (B3, D3), jnp.float32)
    l3 = jax.random.randint(k6, (B3,), 0, 10, jnp.int32)
    out3 = MagnetLoss(margin=2)(f3, l3)
    jax.block_until_ready(out3)
    r3 = _reference(f3, l3, margin=2.0)
    assert jnp.allclose(out3, r3, rtol=1e-4, atol=1e-5), (out3, r3)

    print("KERNEL_OK")
</pallas_src>

<mosaic_0001>
module attributes {stable_mosaic.version = 11 : i64} {
  func.func @kernel(%arg0: i32, %arg1: memref<1xi32, #tpu.memory_space<smem>>, %arg2: memref<1xi32, #tpu.memory_space<smem>>, %arg3: memref<32x32xf32, #tpu.memory_space<vmem>>, %arg4: memref<32x32xf32, #tpu.memory_space<vmem>>, %arg5: memref<32x1xi32, #tpu.memory_space<vmem>>, %arg6: memref<1x32xi32, #tpu.memory_space<vmem>>, %arg7: memref<32x1xf32, #tpu.memory_space<vmem>>, %arg8: memref<1x32xf32, #tpu.memory_space<vmem>>, %arg9: memref<1x1x32xf32, #tpu.memory_space<vmem>>) attributes {dimension_semantics = [#tpu.dimension_semantics<parallel>], iteration_bounds = array<i64: 1>, scalar_prefetch = 2 : i64, scratch_operands = 0 : i64, tpu.core_type = #tpu.core_type<tc>, window_params = [{transform_indices = @transform_0, window_bounds = array<i64: 32, 32>}, {transform_indices = @transform_1, window_bounds = array<i64: 32, 32>}, {transform_indices = @transform_2, window_bounds = array<i64: 32, 1>}, {pipeline_mode = #tpu.pipeline_mode<synchronous>, transform_indices = @transform_3, window_bounds = array<i64: 1, 32>}, {transform_indices = @transform_4, window_bounds = array<i64: 32, 1>}, {pipeline_mode = #tpu.pipeline_mode<synchronous>, transform_indices = @transform_5, window_bounds = array<i64: 1, 32>}, {transform_indices = @transform_6, window_bounds = array<i64: 1, 1, 32>}]} {
    %0 = arith.index_cast %arg0 : i32 to index
    %1 = memref.load %arg1[%0] : memref<1xi32, #tpu.memory_space<smem>>
    %2 = arith.index_cast %arg0 : i32 to index
    %3 = memref.load %arg2[%2] : memref<1xi32, #tpu.memory_space<smem>>
    %c0 = arith.constant 0 : index
    %c0_0 = arith.constant 0 : index
    %4 = vector.load %arg3[%c0, %c0_0] : memref<32x32xf32, #tpu.memory_space<vmem>>, vector<32x32xf32>
    %c0_1 = arith.constant 0 : index
    %c0_2 = arith.constant 0 : index
    %5 = vector.load %arg4[%c0_1, %c0_2] : memref<32x32xf32, #tpu.memory_space<vmem>>, vector<32x32xf32>
    %cst = arith.constant dense<0.000000e+00> : vector<32x32xf32>
    %6 = tpu.matmul %4, %5, %cst {dimension_numbers = #tpu.dot_dimension_numbers<[1], [1], [0], [0], [0, 0, 1, 0], [], []>} : vector<32x32xf32>, vector<32x32xf32>, vector<32x32xf32> -> vector<32x32xf32>
    %7 = arith.index_cast %3 : i32 to index
    %c0_3 = arith.constant 0 : index
    %8 = vector.load %arg8[%7, %c0_3] : memref<1x32xf32, #tpu.memory_space<vmem>>, vector<1x32xf32>
    %9 = arith.index_cast %3 : i32 to index
    %c0_4 = arith.constant 0 : index
    %10 = vector.load %arg6[%9, %c0_4] : memref<1x32xi32, #tpu.memory_space<vmem>>, vector<1x32xi32>
    %c0_5 = arith.constant 0 : index
    %c0_6 = arith.constant 0 : index
    %11 = vector.load %arg7[%c0_5, %c0_6] : memref<32x1xf32, #tpu.memory_space<vmem>>, vector<32x1xf32>
    %12 = vector.broadcast %11 : vector<32x1xf32> to vector<32x32xf32>
    %13 = vector.broadcast %8 : vector<1x32xf32> to vector<32x32xf32>
    %14 = arith.addf %12, %13 : vector<32x32xf32>
    %cst_7 = arith.constant 2.000000e+00 : f32
    %15 = vector.broadcast %cst_7 : f32 to vector<32x32xf32>
    %16 = arith.mulf %15, %6 : vector<32x32xf32>
    %17 = arith.subf %14, %16 : vector<32x32xf32>
    %cst_8 = arith.constant 0.000000e+00 : f32
    %18 = vector.broadcast %cst_8 : f32 to vector<32x32xf32>
    %19 = arith.maximumf %17, %18 : vector<32x32xf32>
    %20 = math.sqrt %19 : vector<32x32xf32>
    %cst_9 = arith.constant 2.000000e+00 : f32
    %21 = vector.broadcast %cst_9 : f32 to vector<32x32xf32>
    %22 = arith.subf %21, %20 : vector<32x32xf32>
    %cst_10 = arith.constant 0.000000e+00 : f32
    %23 = vector.broadcast %cst_10 : f32 to vector<32x32xf32>
    %24 = arith.maximumf %22, %23 : vector<32x32xf32>
    %c0_11 = arith.constant 0 : index
    %c0_12 = arith.constant 0 : index
    %25 = vector.load %arg5[%c0_11, %c0_12] : memref<32x1xi32, #tpu.memory_space<vmem>>, vector<32x1xi32>
    %26 = vector.broadcast %25 : vector<32x1xi32> to vector<32x32xi32>
    %27 = vector.broadcast %10 : vector<1x32xi32> to vector<32x32xi32>
    %28 = arith.cmpi eq, %26, %27 : vector<32x32xi32>
    %29 = arith.mulf %24, %24 : vector<32x32xf32>
    %30 = arith.select %28, %19, %29 : vector<32x32xi1>, vector<32x32xf32>
    %31 = arith.cmpi eq, %1, %3 : i32
    %cst_13 = arith.constant 1.000000e+00 : f32
    %cst_14 = arith.constant 2.000000e+00 : f32
    %32 = arith.select %31, %cst_13, %cst_14 : f32
    %cst_15 = arith.constant dense<0.000000e+00> : vector<32xf32>
    %33 = vector.multi_reduction <add>, %30, %cst_15 [0] : vector<32x32xf32> to vector<32xf32>
    %34 = vector.shape_cast %33 : vector<32xf32> to vector<1x32xf32>
    %35 = vector.broadcast %32 : f32 to vector<1x32xf32>
    %36 = arith.mulf %35, %34 : vector<1x32xf32>
    %c0_16 = arith.constant 0 : index
    %c0_17 = arith.constant 0 : index
    %c0_18 = arith.constant 0 : index
    %37 = vector.load %arg9[%c0_16, %c0_17, %c0_18] : memref<1x1x32xf32, #tpu.memory_space<vmem>>, vector<1x1x32xf32>
    %38 = vector.shape_cast %37 : vector<1x1x32xf32> to vector<1x32xf32>
    %39 = vector.shape_cast %36 : vector<1x32xf32> to vector<1x1x32xf32>
    tpu.vector_store %arg9[%c0_16, %c0_17, %c0_18], %39 {strides = array<i32>} : memref<1x1x32xf32, #tpu.memory_space<vmem>>, vector<1x1x32xf32>,
    return
  }
  func.func @transform_0(%arg0: i32, %arg1: memref<1xi32, #tpu.memory_space<smem>>, %arg2: memref<1xi32, #tpu.memory_space<smem>>) -> (i32, i32) {
    %0 = arith.index_cast %arg0 : i32 to index
    %1 = memref.load %arg1[%0] : memref<1xi32, #tpu.memory_space<smem>>
    %c0_i32 = arith.constant 0 : i32
    %c0_i32_0 = arith.constant 0 : i32
    return %1, %c0_i32 : i32, i32
  }
  func.func @transform_1(%arg0: i32, %arg1: memref<1xi32, #tpu.memory_space<smem>>, %arg2: memref<1xi32, #tpu.memory_space<smem>>) -> (i32, i32) {
    %0 = arith.index_cast %arg0 : i32 to index
    %1 = memref.load %arg2[%0] : memref<1xi32, #tpu.memory_space<smem>>
    %c0_i32 = arith.constant 0 : i32
    %c0_i32_0 = arith.constant 0 : i32
    return %1, %c0_i32 : i32, i32
  }
  func.func @transform_2(%arg0: i32, %arg1: memref<1xi32, #tpu.memory_space<smem>>, %arg2: memref<1xi32, #tpu.memory_space<smem>>) -> (i32, i32) {
    %0 = arith.index_cast %arg0 : i32 to index
    %1 = memref.load %arg1[%0] : memref<1xi32, #tpu.memory_space<smem>>
    %c0_i32 = arith.constant 0 : i32
    %c0_i32_0 = arith.constant 0 : i32
    return %1, %c0_i32 : i32, i32
  }
  func.func @transform_3(%arg0: i32, %arg1: memref<1xi32, #tpu.memory_space<smem>>, %arg2: memref<1xi32, #tpu.memory_space<smem>>) -> (i32, i32) {
    %c0_i32 = arith.constant 0 : i32
    %c0_i32_0 = arith.constant 0 : i32
    %c0_i32_1 = arith.constant 0 : i32
    return %c0_i32, %c0_i32_0 : i32, i32
  }
  func.func @transform_4(%arg0: i32, %arg1: memref<1xi32, #tpu.memory_space<smem>>, %arg2: memref<1xi32, #tpu.memory_space<smem>>) -> (i32, i32) {
    %0 = arith.index_cast %arg0 : i32 to index
    %1 = memref.load %arg1[%0] : memref<1xi32, #tpu.memory_space<smem>>
    %c0_i32 = arith.constant 0 : i32
    %c0_i32_0 = arith.constant 0 : i32
    return %1, %c0_i32 : i32, i32
  }
  func.func @transform_5(%arg0: i32, %arg1: memref<1xi32, #tpu.memory_space<smem>>, %arg2: memref<1xi32, #tpu.memory_space<smem>>) -> (i32, i32) {
    %c0_i32 = arith.constant 0 : i32
    %c0_i32_0 = arith.constant 0 : i32
    %c0_i32_1 = arith.constant 0 : i32
    return %c0_i32, %c0_i32_0 : i32, i32
  }
  func.func @transform_6(%arg0: i32, %arg1: memref<1xi32, #tpu.memory_space<smem>>, %arg2: memref<1xi32, #tpu.memory_space<smem>>) -> (i32, i32, i32) {
    %c0_i32 = arith.constant 0 : i32
    %c0_i32_0 = arith.constant 0 : i32
    %c0_i32_1 = arith.constant 0 : i32
    return %arg0, %c0_i32, %c0_i32_0 : i32, i32, i32
  }
}

</mosaic_0001>

<bundles_post_ra>
// kernel: _magnet_loss_pallas.1
= control target key start
LH: loop header
LB: loop body
LE: loop exit
PB: predicated region body
PF: predicated region fallthrough
CT: control target
= control target key end

     0   :  { %v461_v0 = vmov 0   ;;  %vm125_vm0 = vcmask 261120   ;;  %vm370_vm13 = vcmask 253952   ;;  %s598_s1 = inlined_call_operand.<no memory space> [shape: s32[1], index: 1, kind: input, shape index: {}, may-alias: {0,1}]   ;;  %s599_s0 = inlined_call_operand.<no memory space> [shape: s32[1], index: 0, kind: input, shape index: {}, may-alias: {0,1}]   ;;  %s600_s3 = inlined_call_operand.vmem [shape: f32[32,32], index: 3, kind: input, shape index: {}, may-alias: {2,3}]   ;;  %s601_s2 = inlined_call_operand.vmem [shape: f32[32,32], index: 2, kind: input, shape index: {}, may-alias: {2,3}]   ;;  %s602_s6 = inlined_call_operand.vmem [shape: f32[32,1], index: 6, kind: input, shape index: {}]   ;;  %s603_s4 = inlined_call_operand.vmem [shape: s32[32,1], index: 4, kind: input, shape index: {}]   ;;  %s604_s7 = inlined_call_operand.vmem [shape: f32[1,32], index: 7, kind: input, shape index: {}]   ;;  %s605_s5 = inlined_call_operand.vmem [shape: s32[1,32], index: 5, kind: input, shape index: {}]   ;;  %s606_s8 = inlined_call_operand.vmem [shape: f32[1,1,32], index: 8, kind: output, shape index: {}]  }
   0x1   :  { %s404_s29 = sshll.u32 %s598_s1, 2  ;;  %s402_s10 = sshll.u32 %s599_s0, 2  ;;  %451 = vset.pattern.permute.xlu0 %v461_v0  ;;  %452 = vset.pattern.permute.xlu1 %v461_v0 }
   0x2   :  { %p93_p0 = scmp.lt.s32.totalorder %s404_s29, 3  ;;  %p85_p1 = scmp.lt.s32.totalorder %s402_s10, 3 }
   0x3   :  { %p353_p2 = scmp.eq.s32.totalorder %s599_s0, %s598_s1  ;;  %s237_s11 = scalar_lea.vmem %s605_s5, %s598_s1 }
   0x4   :  { %s608_s29 = smov (!%p93_p0, %s404_s29), 3  ;;  %s610_s10 = smov (!%p85_p1, %s402_s10), 3 }
   0x5   :  { %s405_s15 = sshll.u32 %s608_s29, 3  ;;  %s403_s19 = sshll.u32 %s610_s10, 3 }
   0x6   :  { %s522_s18 = scalar_lea.vmem %s600_s3, %s405_s15  ;;  %s529_s22 = scalar_lea.vmem %s601_s2, %s403_s19 }
   0x7   :  { %v124_v1 = vld [vmem:[%s522_s18 + $0x18] sm:$0xff]  ;;  %v123_v2 = vld [vmem:[%s522_s18 + $0x10] sm:$0xff]  ;;  %s112_s25 = scalar_lea.vmem %s602_s6, %s403_s19  ;;  %v117_v3 = vld [vmem:[%s529_s22] sm:$0xff]  ;;  %s104_s6 = scalar_lea.vmem %s603_s4, %s403_s19 }
   0x8   :  { %428 = vmatprep.subr.msk.mxu0 %vm125_vm0, %v124_v1  ;;  %442 = vmatprep.subr.msk.mxu1 %vm125_vm0, %v124_v1  ;;  %v119_v4 = vld [vmem:[%s529_s22 + $0x10] sm:$0xff]  ;;  %v239_v5 = vld [vmem:[%s112_s25] sm:$0xff]  ;;  %v122_v7 = vld [vmem:[%s522_s18 + $0x8] sm:$0xff]  ;;  %s235_s29 = scalar_lea.vmem %s604_s7, %s598_s1 }
   0x9   :  { %429 = vmatpush3.xpose.msk.msra.mxu0 %vm125_vm0, %v124_v1  ;;  %446 = vmatpush3.xpose.msk.msra.mxu1 %vm125_vm0, %v124_v1  ;;  %v241_v6 = vld [vmem:[%s112_s25 + $0x10] sm:$0xff]  ;;  %v240_v8 = vld [vmem:[%s112_s25 + $0x8] sm:$0xff]  ;;  %v242_v9 = vld [vmem:[%s112_s25 + $0x18] sm:$0xff]  ;;  %s354_s15 = scalar_select %p353_p2, 1.0, 2.0 }
   0xa   :  { %430 = vmatprep.subr.msk.mxu0 %vm125_vm0, %v123_v2  ;;  %443 = vmatprep.subr.msk.mxu1 %vm125_vm0, %v123_v2  ;;  %v121_v10 = vld [vmem:[%s522_s18] sm:$0xff]  ;;  %v322_v12 = vld [vmem:[%s104_s6 + $0x8] sm:$0xff]  ;;  %v120_v14 = vld [vmem:[%s529_s22 + $0x18] sm:$0xff] }
   0xb   :  { %436 = vmatprep.mubr.msk.f32.mxu0 %vm125_vm0, %v117_v3  ;;  %439 = vmatprep.mubr.msk.f32.mxu1 %vm125_vm0, %v119_v4  ;;  %v321_v11 = vld [vmem:[%s104_s6] sm:$0xff]  ;;  %v118_v13 = vld [vmem:[%s529_s22 + $0x8] sm:$0xff]  ;;  %v323_v15 = vld [vmem:[%s104_s6 + $0x10] sm:$0xff] }
   0xc   :  { %245 = vperm.xlu0 %451, %v239_v5   ;;  %255 = vperm.xlu1 %452, %v241_v6   ;;  %v324_v16 = vld [vmem:[%s104_s6 + $0x18] sm:$0xff]  ;;  %v418_v19 = vld [vmem:[%s235_s29] ss:$0 sm:$0xff] }
   0xd   :  { %431 = vmatpush3.xpose.msk.msra.mxu0 %vm125_vm0, %v123_v2  ;;  %447 = vmatpush3.xpose.msk.msra.mxu1 %vm125_vm0, %v123_v2 }
   0xe   :  { %432 = vmatprep.subr.msk.mxu0 %vm125_vm0, %v122_v7  ;;  %444 = vmatprep.subr.msk.mxu1 %vm125_vm0, %v122_v7 }
  0x10   :  { %250 = vperm.xlu0 %451, %v240_v8   ;;  %260 = vperm.xlu1 %452, %v242_v9  }
  0x11   :  { %433 = vmatpush3.xpose.msk.msra.mxu0 %vm125_vm0, %v122_v7  ;;  %448 = vmatpush3.xpose.msk.msra.mxu1 %vm125_vm0, %v122_v7  ;;  %v419_v7 = vld [vmem:[%s237_s11] ss:$0 sm:$0xff] }
  0x12   :  { %434 = vmatprep.subr.msk.mxu0 %vm125_vm0, %v121_v10  ;;  %445 = vmatprep.subr.msk.mxu1 %vm125_vm0, %v121_v10 }
  0x14   :  { %326 = vperm.xlu0 %451, %v321_v11   ;;  %329 = vperm.xlu1 %452, %v322_v12  }
  0x15   :  { %435 = vmatpush3.xpose.msk.msra.mxu0 %vm125_vm0, %v121_v10  ;;  %449 = vmatpush3.xpose.msk.msra.mxu1 %vm125_vm0, %v121_v10 }
  0x18   :  { %437 = vmatmul.mubr.msk.f32.vlgmr.msra.gmra.mxu0 %vm125_vm0, %v118_v13  ;;  %440 = vmatmul.mubr.msk.f32.vlgmr.msra.gmra.mxu1 %vm125_vm0, %v120_v14 }
  0x19   :  { %332 = vperm.xlu0 %451, %v323_v15   ;;  %335 = vperm.xlu1 %452, %v324_v16  }
  0x87   :  { %v256_v17 = vpop.permute.xlu1 %255  ;;  %v246_v18 = vpop.permute.xlu0 %245 }
  0x88   :  { %v271_v25 = vadd.f32 %v418_v19, %v256_v17  ;;  %v269_v29 = vadd.f32 %v418_v19, %v246_v18 }
  0x8b   :  { %v261_v20 = vpop.permute.xlu1 %260  ;;  %v251_v21 = vpop.permute.xlu0 %250 }
  0x8c   :  { %v272_v22 = vadd.f32 %v418_v19, %v261_v20  ;;  %v270_v26 = vadd.f32 %v418_v19, %v251_v21 }
  0x8f   :  { %v327_v56 = vpop.permute.xlu0 %326  ;;  %v330_v60 = vpop.permute.xlu1 %329 }
  0x90   :  { %vm342_vm9 = vcmp.eq.s32.totalorder %v330_v60, %v419_v7  ;;  %vm341_vm10 = vcmp.eq.s32.totalorder %v327_v56, %v419_v7 }
  0x94   :  { %v333_v9 = vpop.permute.xlu0 %332  ;;  %v336_v12 = vpop.permute.xlu1 %335 }
  0x95   :  { %vm343_vm11 = vcmp.eq.s32.totalorder %v333_v9, %v419_v7  ;;  %vm344_vm12 = vcmp.eq.s32.totalorder %v336_v12, %v419_v7 }
  0xd8   :  { %v438_v23 = vpop.f32.mrf.mxu0  ;;  %v441_v24 = vpop.f32.mrf.mxu1 }
  0xd9   :  { %v274_v27 = vmul.f32 2.0, %v438_v23  ;;  %v276_v28 = vmul.f32 2.0, %v441_v24 }
  0xda   :  { %v216_v30 = vpop.f32.mrf.mxu0  ;;  %v226_v31 = vpop.f32.mrf.mxu1 }
  0xdb   :  { %v278_v32 = vsub.f32 %v270_v26, %v274_v27  ;;  %v280_v33 = vsub.f32 %v272_v22, %v276_v28  ;;  %v273_v34 = vmul.f32 2.0, %v216_v30  ;;  %v275_v35 = vmul.f32 2.0, %v226_v31 }
  0xdc   :  { %v368_v31 = vstv %s354_s15 }
  0xdd   :  { %v282_v36 = vmax.f32 %v278_v32, 0.0  ;;  %v569_v37 = vmax.f32 %v280_v33, 0.0  ;;  %v277_v38 = vsub.f32 %v269_v29, %v273_v34  ;;  %v279_v39 = vsub.f32 %v271_v25, %v275_v35 }
  0xdf   :  { %453 = vrsqrt.f32 %v282_v36  ;;  %v281_v40 = vmax.f32 %v277_v38, 0.0  ;;  %v283_v41 = vmax.f32 %v279_v39, 0.0  ;;  %vm294_vm1 = vcmp.eq.f32.partialorder %v282_v36, inf }
  0xe0   :  { %455 = vrsqrt.f32 %v569_v37  ;;  %v297_v45 = vand.u32 2147483648, %v282_v36  ;;  %vm296_vm2 = vcmp.eq.f32.partialorder %v282_v36, 0.0  ;;  %vm308_vm3 = vcmp.eq.f32.partialorder %v569_v37, inf }
  0xe1   :  { %457 = vrsqrt.f32 %v281_v40  ;;  %v311_v48 = vand.u32 2147483648, %v569_v37  ;;  %vm310_vm4 = vcmp.eq.f32.partialorder %v569_v37, 0.0  ;;  %vm287_vm5 = vcmp.eq.f32.partialorder %v281_v40, inf }
  0xe2   :  { %459 = vrsqrt.f32 %v283_v41  ;;  %vm289_vm6 = vcmp.eq.f32.partialorder %v281_v40, 0.0  ;;  %v290_v58 = vand.u32 2147483648, %v281_v40  ;;  %vm301_vm7 = vcmp.eq.f32.partialorder %v283_v41, inf }
  0xe3   :  { %v304_v63 = vand.u32 2147483648, %v283_v41  ;;  %vm303_vm8 = vcmp.eq.f32.partialorder %v283_v41, 0.0 }
  0xec   :  { %v454_v42 = vpop.eup %453 }
  0xed   :  { %v456_v43 = vpop.eup %455  ;;  %v293_v44 = vmul.f32 %v454_v42, %v282_v36 }
  0xee   :  { %v307_v46 = vmul.f32 %v456_v43, %v569_v37  ;;  %v458_v49 = vpop.eup %457 }
  0xef   :  { %v295_v47 = vsel %vm294_vm1, %v282_v36, %v293_v44  ;;  %v460_v52 = vpop.eup %459  ;;  %v286_v55 = vmul.f32 %v458_v49, %v281_v40 }
  0xf0   :  { %v298_v50 = vsel %vm296_vm2, %v297_v45, %v295_v47  ;;  %v309_v51 = vsel %vm308_vm3, %v569_v37, %v307_v46  ;;  %v300_v59 = vmul.f32 %v460_v52, %v283_v41 }
  0xf1   :  { %v314_v53 = vsub.f32 2.0, %v298_v50  ;;  %v312_v54 = vsel %vm310_vm4, %v311_v48, %v309_v51  ;;  %v288_v62 = vsel %vm287_vm5, %v281_v40, %v286_v55 }
  0xf2   :  { %v316_v57 = vsub.f32 2.0, %v312_v54  ;;  %v291_v0 = vsel %vm289_vm6, %v290_v58, %v288_v62  ;;  %v302_v1 = vsel %vm301_vm7, %v283_v41, %v300_v59 }
  0xf3   :  { %v318_v61 = vmax.f32 %v314_v53, 0.0  ;;  %v313_v4 = vsub.f32 2.0, %v291_v0  ;;  %v305_v5 = vsel %vm303_vm8, %v304_v63, %v302_v1 }
  0xf4   :  { %v320_v3 = vmax.f32 %v316_v57, 0.0  ;;  %v315_v6 = vsub.f32 2.0, %v305_v5 }
  0xf5   :  { %v346_v2 = vmul.f32 %v318_v61, %v318_v61  ;;  %v317_v8 = vmax.f32 %v313_v4, 0.0 }
  0xf6   :  { %v319_v10 = vmax.f32 %v315_v6, 0.0  ;;  %v348_v13 = vmul.f32 %v320_v3, %v320_v3 }
  0xf7   :  { %v350_v11 = vsel %vm342_vm9, %v282_v36, %v346_v2  ;;  %v345_v14 = vmul.f32 %v317_v8, %v317_v8 }
  0xf8   :  { %v347_v15 = vmul.f32 %v319_v10, %v319_v10  ;;  %v356_v17 = vsel %vm125_vm0, %v350_v11, 0.0  ;;  %v352_v20 = vsel %vm344_vm12, %v569_v37, %v348_v13 }
  0xf9   :  { %v349_v16 = vsel %vm341_vm10, %v281_v40, %v345_v14  ;;  %v360_v24 = vsel %vm125_vm0, %v352_v20, 0.0 }
  0xfa   :  { %v355_v18 = vsel %vm125_vm0, %v349_v16, 0.0  ;;  %v351_v19 = vsel %vm343_vm11, %v283_v41, %v347_v15 }
  0xfb   :  { %v357_v21 = vadd.f32 %v356_v17, %v355_v18  ;;  %v358_v22 = vsel %vm125_vm0, %v351_v19, 0.0 }
  0xfd   :  { %v359_v23 = vadd.f32 %v358_v22, %v357_v21 }
  0xff   :  { %v361_v25 = vadd.f32 %v360_v24, %v359_v23 }
 0x101   :  { %v362_v26 = vrot.slane %v361_v25, 4 }
 0x103   :  { %v363_v27 = vadd.f32 %v362_v26, %v361_v25 }
 0x105   :  { %v364_v28 = vrot.slane %v363_v27, 2 }
 0x107   :  { %v365_v29 = vadd.f32 %v364_v28, %v363_v27 }
 0x109   :  { %v366_v30 = vrot.slane %v365_v29, 1 }
 0x10b   :  { %v367_v32 = vadd.f32 %v366_v30, %v365_v29 }
 0x10d   :  { %v369_v33 = vmul.f32 %v368_v31, %v367_v32 }
 0x10f   :  { %371 = vst.msk [vmem:[%s606_s8] sm:$0x1] %vm370_vm13, %v369_v33 }

</bundles_post_ra>
